<compile_context>
chip_gen: v5e
topology: v5e:2x2
jax: 0.10.0
libtpu: 0.0.40
codegen_flags: <defaults>
</compile_context>

<pallas_src>
import functools

import jax
import jax.numpy as jnp
from jax import lax
from jax.experimental import pallas as pl
from jax.experimental.pallas import tpu as pltpu


def _spatial_attention_kernel(gamma_ref, x_ref, w_ref, b_ref, o_ref, *, C8p, Bblk):
    gamma = gamma_ref[0, 0]
    w = w_ref[...]                                        # (Cs, C)  stacked q/k/v weights
    b = b_ref[...]                                        # (Cs, 1)  stacked q/k/v biases

    for bb in range(Bblk):                                # small static unroll
        xb = x_ref[bb]                                    # (C, T)
        xb_f32 = xb.astype(jnp.float32)

        # Fused q/k/v projection: one MXU matmul + one broadcast bias add.
        qkv = jnp.dot(w, xb, preferred_element_type=jnp.float32) + b   # (Cs, T) f32

        q = qkv[:C8p]                                     # (C8p, T)  (zero-padded rows)
        k = qkv[C8p:2 * C8p]                              # (C8p, T)
        v = qkv[2 * C8p:]                                 # (C,   T)

        # energy[i, j] = sum_c q[c, i] * k[c, j]   (no materialized transpose)
        energy = lax.dot_general(q, k, (((0,), (0,)), ((), ())),
                                 preferred_element_type=jnp.float32)   # (T, T)

        # softmax over j (exact max/exp; approx reciprocal for the denominator)
        p = jnp.exp(energy - jnp.max(energy, axis=-1, keepdims=True))
        attn = p * pl.reciprocal(jnp.sum(p, axis=-1, keepdims=True), approx=True)

        # out[c, i] = sum_j v[c, j] * attn[i, j]   (no materialized transpose)
        out_b = lax.dot_general(v, attn, (((1,), (1,)), ((), ())),
                                preferred_element_type=jnp.float32)    # (C, T)

        o_ref[bb] = (gamma * out_b + xb_f32).astype(o_ref.dtype)


def _round_up(n, m):
    return ((n + m - 1) // m) * m


def _choose_bblk(B, C, T, itemsize, *, vmem_budget=4 << 20, max_unroll=8):
    """Largest divisor of B that keeps the x block small and the unroll bounded."""
    best = 1
    for bblk in range(1, B + 1):
        if B % bblk:
            continue
        if bblk > max_unroll:
            break
        if bblk * C * T * itemsize > vmem_budget:
            break
        best = bblk
    return best


def spatial_attention(x, wq, bq, wk, bk, wv, bv, gamma, *, compute_dtype=None):
    """x: (B, C, T). wq/wk: (C//8, C); wv: (C, C); biases are column vectors (out, 1);
    gamma: (1,).  Matches SpatialAttention.forward of the PyTorch module."""
    B, C, T = x.shape
    C8 = wq.shape[0]
    if compute_dtype is None:
        compute_dtype = x.dtype

    # Pad q/k weight rows to a multiple of 8 so the in-kernel split is
    # sublane-aligned; padded rows are zero => exact (contribute 0 to q^T k).
    C8p = _round_up(C8, 8)

    def pad_rows(w, b, rows):
        pad = rows - w.shape[0]
        if pad:
            w = jnp.concatenate([w, jnp.zeros((pad, w.shape[1]), w.dtype)], axis=0)
            b = jnp.concatenate([b, jnp.zeros((pad, 1), b.dtype)], axis=0)
        return w, b

    wq_p, bq_p = pad_rows(wq, bq, C8p)
    wk_p, bk_p = pad_rows(wk, bk, C8p)

    # Stack the three 1x1-conv weights/biases -> one matmul inside the kernel.
    # (On v6e/v7x, pass compute_dtype=jnp.bfloat16 to feed the MXU in bf16;
    #  softmax / gamma scale / residual stay f32 in-kernel.)
    ws = jnp.concatenate([wq_p, wk_p, wv], axis=0).astype(compute_dtype)   # (Cs, C)
    bs = jnp.concatenate([bq_p, bk_p, bv], axis=0).astype(jnp.float32)     # (Cs, 1)
    Cs = 2 * C8p + C

    Bblk = _choose_bblk(B, C, T, jnp.dtype(compute_dtype).itemsize)
    grid = (B // Bblk,)

    gamma2 = jnp.reshape(gamma, (1, 1)).astype(jnp.float32)
    x_in = x.astype(compute_dtype)

    kernel = functools.partial(_spatial_attention_kernel, C8p=C8p, Bblk=Bblk)

    out = pl.pallas_call(
        kernel,
        out_shape=jax.ShapeDtypeStruct((B, C, T), x.dtype),
        grid_spec=pltpu.PrefetchScalarGridSpec(
            num_scalar_prefetch=0,
            grid=grid,
            in_specs=[
                pl.BlockSpec((1, 1), lambda b: (0, 0), memory_space=pltpu.SMEM),  # gamma
                pl.BlockSpec((Bblk, C, T), lambda b: (b, 0, 0)),                  # x
                pl.BlockSpec((Cs, C), lambda b: (0, 0)),                          # stacked W
                pl.BlockSpec((Cs, 1), lambda b: (0, 0)),                          # stacked bias
            ],
            out_specs=pl.BlockSpec((Bblk, C, T), lambda b: (b, 0, 0)),
        ),
        compiler_params=pltpu.CompilerParams(
            dimension_semantics=("parallel",),
        ),
    )(gamma2, x_in, ws, bs)

    return out


def spatial_attention_ref(x, wq, bq, wk, bk, wv, bv, gamma):
    # Pure-JAX reference of the PyTorch forward.
    q = jnp.einsum("oc,bct->bot", wq, x) + bq[None, :, :]      # (B, C8, T)
    k = jnp.einsum("oc,bct->bot", wk, x) + bk[None, :, :]      # (B, C8, T)
    v = jnp.einsum("oc,bct->bot", wv, x) + bv[None, :, :]      # (B, C,  T)
    energy = jnp.einsum("bci,bcj->bij", q, k)                  # (B, T, T)
    attn = jax.nn.softmax(energy, axis=-1)
    out = jnp.einsum("bcj,bij->bci", v, attn)                  # (B, C, T)
    return gamma[0] * out + x


if __name__ == "__main__":
    B, C, T = 2, 32, 16
    C8 = C // 8

    key = jax.random.PRNGKey(0)
    kx, kwq, kbq, kwk, kbk, kwv, kbv = jax.random.split(key, 7)

    x = jax.random.normal(kx, (B, C, T), dtype=jnp.float32)

    # Conv1d kernel_size=1 parameters as (out, in) matrices + column biases.
    wq = jax.random.normal(kwq, (C8, C), dtype=jnp.float32) * 0.1
    bq = jax.random.normal(kbq, (C8, 1), dtype=jnp.float32) * 0.1
    wk = jax.random.normal(kwk, (C8, C), dtype=jnp.float32) * 0.1
    bk = jax.random.normal(kbk, (C8, 1), dtype=jnp.float32) * 0.1
    wv = jax.random.normal(kwv, (C, C), dtype=jnp.float32) * 0.1
    bv = jax.random.normal(kbv, (C, 1), dtype=jnp.float32) * 0.1
    # PyTorch inits gamma to 0 (output == x); use a nonzero value to exercise the path.
    gamma = jnp.full((1,), 0.5, dtype=jnp.float32)

    out = spatial_attention(x, wq, bq, wk, bk, wv, bv, gamma)
    out = jax.block_until_ready(out)

    ref = spatial_attention_ref(x, wq, bq, wk, bk, wv, bv, gamma)
    assert out.shape == (B, C, T)
    # Tolerance slightly loosened for the approx-reciprocal softmax denominator.
    assert jnp.allclose(out, ref, atol=5e-3, rtol=5e-3), "mismatch vs JAX reference"

    print("KERNEL_OK")
</pallas_src>

<mosaic_0001>
module attributes {stable_mosaic.version = 11 : i64} {
  func.func @_spatial_attention_kernel(%arg0: i32, %arg1: memref<1x1xf32, #tpu.memory_space<smem>>, %arg2: memref<2x32x16xf32, #tpu.memory_space<vmem>>, %arg3: memref<48x32xf32, #tpu.memory_space<vmem>>, %arg4: memref<48x1xf32, #tpu.memory_space<vmem>>, %arg5: memref<2x32x16xf32, #tpu.memory_space<vmem>>) attributes {dimension_semantics = [#tpu.dimension_semantics<parallel>], iteration_bounds = array<i64: 1>, scalar_prefetch = 0 : i64, scratch_operands = 0 : i64, tpu.core_type = #tpu.core_type<tc>, window_params = [{transform_indices = @transform_0, window_bounds = array<i64: 1, 1>}, {transform_indices = @transform_1, window_bounds = array<i64: 2, 32, 16>}, {pipeline_mode = #tpu.pipeline_mode<synchronous>, transform_indices = @transform_2, window_bounds = array<i64: 48, 32>}, {pipeline_mode = #tpu.pipeline_mode<synchronous>, transform_indices = @transform_3, window_bounds = array<i64: 48, 1>}, {transform_indices = @transform_4, window_bounds = array<i64: 2, 32, 16>}]} {
    %c0 = arith.constant 0 : index
    %c0_0 = arith.constant 0 : index
    %0 = memref.load %arg1[%c0, %c0_0] : memref<1x1xf32, #tpu.memory_space<smem>>
    %c0_1 = arith.constant 0 : index
    %c0_2 = arith.constant 0 : index
    %1 = vector.load %arg3[%c0_1, %c0_2] : memref<48x32xf32, #tpu.memory_space<vmem>>, vector<48x32xf32>
    %c0_3 = arith.constant 0 : index
    %c0_4 = arith.constant 0 : index
    %2 = vector.load %arg4[%c0_3, %c0_4] : memref<48x1xf32, #tpu.memory_space<vmem>>, vector<48x1xf32>
    %c0_5 = arith.constant 0 : index
    %c0_6 = arith.constant 0 : index
    %c0_7 = arith.constant 0 : index
    %3 = vector.load %arg2[%c0_5, %c0_6, %c0_7] : memref<2x32x16xf32, #tpu.memory_space<vmem>>, vector<1x32x16xf32>
    %4 = vector.shape_cast %3 : vector<1x32x16xf32> to vector<32x16xf32>
    %cst = arith.constant dense<0.000000e+00> : vector<48x16xf32>
    %5 = tpu.matmul %1, %4, %cst {dimension_numbers = #tpu.dot_dimension_numbers<[1], [0], [0], [1], [0, 0, 1, 1], [], []>} : vector<48x32xf32>, vector<32x16xf32>, vector<48x16xf32> -> vector<48x16xf32>
    %6 = vector.broadcast %2 : vector<48x1xf32> to vector<48x16xf32>
    %7 = arith.addf %5, %6 : vector<48x16xf32>
    %8 = vector.extract_strided_slice %7 {offsets = [0, 0], sizes = [8, 16], strides = [1, 1]} : vector<48x16xf32> to vector<8x16xf32>
    %9 = vector.extract_strided_slice %7 {offsets = [8, 0], sizes = [8, 16], strides = [1, 1]} : vector<48x16xf32> to vector<8x16xf32>
    %10 = vector.extract_strided_slice %7 {offsets = [16, 0], sizes = [32, 16], strides = [1, 1]} : vector<48x16xf32> to vector<32x16xf32>
    %cst_8 = arith.constant dense<0.000000e+00> : vector<16x16xf32>
    %11 = tpu.matmul %8, %9, %cst_8 {dimension_numbers = #tpu.dot_dimension_numbers<[0], [0], [1], [1], [0, 1, 1, 1], [], []>} : vector<8x16xf32>, vector<8x16xf32>, vector<16x16xf32> -> vector<16x16xf32>
    %cst_9 = arith.constant dense<0xFF800000> : vector<16xf32>
    %12 = vector.multi_reduction <maximumf>, %11, %cst_9 [1] : vector<16x16xf32> to vector<16xf32>
    %13 = vector.shape_cast %12 : vector<16xf32> to vector<16x1xf32>
    %14 = vector.broadcast %13 : vector<16x1xf32> to vector<16x16xf32>
    %15 = arith.subf %11, %14 : vector<16x16xf32>
    %16 = math.exp %15 : vector<16x16xf32>
    %cst_10 = arith.constant dense<0.000000e+00> : vector<16xf32>
    %17 = vector.multi_reduction <add>, %16, %cst_10 [1] : vector<16x16xf32> to vector<16xf32>
    %18 = vector.shape_cast %17 : vector<16xf32> to vector<16x1xf32>
    %19 = tpu.reciprocal %18 {approx = true} : vector<16x1xf32> -> vector<16x1xf32>
    %20 = vector.broadcast %19 : vector<16x1xf32> to vector<16x16xf32>
    %21 = arith.mulf %16, %20 : vector<16x16xf32>
    %cst_11 = arith.constant dense<0.000000e+00> : vector<32x16xf32>
    %22 = tpu.matmul %10, %21, %cst_11 {dimension_numbers = #tpu.dot_dimension_numbers<[1], [1], [0], [0], [0, 0, 1, 0], [], []>} : vector<32x16xf32>, vector<16x16xf32>, vector<32x16xf32> -> vector<32x16xf32>
    %23 = vector.broadcast %0 : f32 to vector<32x16xf32>
    %24 = arith.mulf %23, %22 : vector<32x16xf32>
    %25 = arith.addf %24, %4 : vector<32x16xf32>
    %c0_12 = arith.constant 0 : index
    %c0_13 = arith.constant 0 : index
    %c0_14 = arith.constant 0 : index
    %26 = vector.load %arg5[%c0_12, %c0_13, %c0_14] : memref<2x32x16xf32, #tpu.memory_space<vmem>>, vector<1x32x16xf32>
    %27 = vector.shape_cast %26 : vector<1x32x16xf32> to vector<32x16xf32>
    %28 = vector.shape_cast %25 : vector<32x16xf32> to vector<1x32x16xf32>
    tpu.vector_store %arg5[%c0_12, %c0_13, %c0_14], %28 {strides = array<i32>} : memref<2x32x16xf32, #tpu.memory_space<vmem>>, vector<1x32x16xf32>,
    %c1 = arith.constant 1 : index
    %c0_15 = arith.constant 0 : index
    %c0_16 = arith.constant 0 : index
    %29 = vector.load %arg2[%c1, %c0_15, %c0_16] : memref<2x32x16xf32, #tpu.memory_space<vmem>>, vector<1x32x16xf32>
    %30 = vector.shape_cast %29 : vector<1x32x16xf32> to vector<32x16xf32>
    %cst_17 = arith.constant dense<0.000000e+00> : vector<48x16xf32>
    %31 = tpu.matmul %1, %30, %cst_17 {dimension_numbers = #tpu.dot_dimension_numbers<[1], [0], [0], [1], [0, 0, 1, 1], [], []>} : vector<48x32xf32>, vector<32x16xf32>, vector<48x16xf32> -> vector<48x16xf32>
    %32 = vector.broadcast %2 : vector<48x1xf32> to vector<48x16xf32>
    %33 = arith.addf %31, %32 : vector<48x16xf32>
    %34 = vector.extract_strided_slice %33 {offsets = [0, 0], sizes = [8, 16], strides = [1, 1]} : vector<48x16xf32> to vector<8x16xf32>
    %35 = vector.extract_strided_slice %33 {offsets = [8, 0], sizes = [8, 16], strides = [1, 1]} : vector<48x16xf32> to vector<8x16xf32>
    %36 = vector.extract_strided_slice %33 {offsets = [16, 0], sizes = [32, 16], strides = [1, 1]} : vector<48x16xf32> to vector<32x16xf32>
    %cst_18 = arith.constant dense<0.000000e+00> : vector<16x16xf32>
    %37 = tpu.matmul %34, %35, %cst_18 {dimension_numbers = #tpu.dot_dimension_numbers<[0], [0], [1], [1], [0, 1, 1, 1], [], []>} : vector<8x16xf32>, vector<8x16xf32>, vector<16x16xf32> -> vector<16x16xf32>
    %cst_19 = arith.constant dense<0xFF800000> : vector<16xf32>
    %38 = vector.multi_reduction <maximumf>, %37, %cst_19 [1] : vector<16x16xf32> to vector<16xf32>
    %39 = vector.shape_cast %38 : vector<16xf32> to vector<16x1xf32>
    %40 = vector.broadcast %39 : vector<16x1xf32> to vector<16x16xf32>
    %41 = arith.subf %37, %40 : vector<16x16xf32>
    %42 = math.exp %41 : vector<16x16xf32>
    %cst_20 = arith.constant dense<0.000000e+00> : vector<16xf32>
    %43 = vector.multi_reduction <add>, %42, %cst_20 [1] : vector<16x16xf32> to vector<16xf32>
    %44 = vector.shape_cast %43 : vector<16xf32> to vector<16x1xf32>
    %45 = tpu.reciprocal %44 {approx = true} : vector<16x1xf32> -> vector<16x1xf32>
    %46 = vector.broadcast %45 : vector<16x1xf32> to vector<16x16xf32>
    %47 = arith.mulf %42, %46 : vector<16x16xf32>
    %cst_21 = arith.constant dense<0.000000e+00> : vector<32x16xf32>
    %48 = tpu.matmul %36, %47, %cst_21 {dimension_numbers = #tpu.dot_dimension_numbers<[1], [1], [0], [0], [0, 0, 1, 0], [], []>} : vector<32x16xf32>, vector<16x16xf32>, vector<32x16xf32> -> vector<32x16xf32>
    %49 = vector.broadcast %0 : f32 to vector<32x16xf32>
    %50 = arith.mulf %49, %48 : vector<32x16xf32>
    %51 = arith.addf %50, %30 : vector<32x16xf32>
    %c1_22 = arith.constant 1 : index
    %c0_23 = arith.constant 0 : index
    %c0_24 = arith.constant 0 : index
    %52 = vector.load %arg5[%c1_22, %c0_23, %c0_24] : memref<2x32x16xf32, #tpu.memory_space<vmem>>, vector<1x32x16xf32>
    %53 = vector.shape_cast %52 : vector<1x32x16xf32> to vector<32x16xf32>
    %54 = vector.shape_cast %51 : vector<32x16xf32> to vector<1x32x16xf32>
    tpu.vector_store %arg5[%c1_22, %c0_23, %c0_24], %54 {strides = array<i32>} : memref<2x32x16xf32, #tpu.memory_space<vmem>>, vector<1x32x16xf32>,
    return
  }
  func.func @transform_0(%arg0: i32) -> (i32, i32) {
    %c0_i32 = arith.constant 0 : i32
    %c0_i32_0 = arith.constant 0 : i32
    %c0_i32_1 = arith.constant 0 : i32
    return %c0_i32, %c0_i32_0 : i32, i32
  }
  func.func @transform_1(%arg0: i32) -> (i32, i32, i32) {
    %c0_i32 = arith.constant 0 : i32
    %c0_i32_0 = arith.constant 0 : i32
    %c0_i32_1 = arith.constant 0 : i32
    return %arg0, %c0_i32, %c0_i32_0 : i32, i32, i32
  }
  func.func @transform_2(%arg0: i32) -> (i32, i32) {
    %c0_i32 = arith.constant 0 : i32
    %c0_i32_0 = arith.constant 0 : i32
    %c0_i32_1 = arith.constant 0 : i32
    return %c0_i32, %c0_i32_0 : i32, i32
  }
  func.func @transform_3(%arg0: i32) -> (i32, i32) {
    %c0_i32 = arith.constant 0 : i32
    %c0_i32_0 = arith.constant 0 : i32
    %c0_i32_1 = arith.constant 0 : i32
    return %c0_i32, %c0_i32_0 : i32, i32
  }
  func.func @transform_4(%arg0: i32) -> (i32, i32, i32) {
    %c0_i32 = arith.constant 0 : i32
    %c0_i32_0 = arith.constant 0 : i32
    %c0_i32_1 = arith.constant 0 : i32
    return %arg0, %c0_i32, %c0_i32_0 : i32, i32, i32
  }
}

</mosaic_0001>

<bundles_post_ra>
// kernel: tpu_custom_call.1
= control target key start
LH: loop header
LB: loop body
LE: loop exit
PB: predicated region body
PF: predicated region fallthrough
CT: control target
= control target key end

     0   :  { %v507_v3 = vmov 0   ;;  %vm65_vm0 = vcmask 261120   ;;  %vm151_vm1 = vcmask 64512   ;;  %vm181_vm2 = vcmask 130048   ;;  %s692_s1 = inlined_call_operand.vmem [shape: f32[2,32,16], index: 1, kind: input, shape index: {}]   ;;  %s693_s3 = inlined_call_operand.vmem [shape: f32[48,1], index: 3, kind: input, shape index: {}]   ;;  %s694_s2 = inlined_call_operand.vmem [shape: f32[48,32], index: 2, kind: input, shape index: {}]   ;;  %s695_s0 = inlined_call_operand.<no memory space> [shape: f32[1,1], index: 0, kind: input, shape index: {}]   ;;  %s696_s4 = inlined_call_operand.vmem [shape: f32[2,32,16], index: 4, kind: output, shape index: {}]  }
   0x1   :  { %v536_v0 = vld [vmem:[%s692_s1 + $0x18] sm:$0xff]  ;;  %v546_v2 = vld [vmem:[%s692_s1 + $0x10] sm:$0xff]  ;;  %489 = vset.pattern.permute.xlu0 %v507_v3  ;;  %490 = vset.pattern.permute.xlu2 %v507_v3  ;;  %v558_v5 = vld [vmem:[%s692_s1 + $0x8] sm:$0xff] }
   0x2   :  { %v541_v1 = vld [vmem:[%s692_s1 + $0x38] sm:$0xff]  ;;  %96 = vmatpush.msra.mxu0 %v536_v0  ;;  %v553_v4 = vld [vmem:[%s692_s1 + $0x30] sm:$0xff]  ;;  %v563_v6 = vld [vmem:[%s692_s1 + $0x28] sm:$0xff] }
   0x3   :  { %281 = vmatpush.msra.mxu3 %v541_v1  ;;  %v25_v7 = vld [vmem:[%s693_s3] sm:$0xff]  ;;  %v26_v11 = vld [vmem:[%s693_s3 + $0x8] sm:$0xff]  ;;  %v21_v27 = vld [vmem:[%s694_s2 + $0x10] sm:$0xff] }
   0x4   :  { %97 = vmatpush.msra.mxu0 %v546_v2  ;;  %v573_v8 = vld [vmem:[%s692_s1] sm:$0xff]  ;;  %37 = vperm.xlu0 %489, %v25_v7   ;;  %v20_v12 = vld [vmem:[%s694_s2 + $0x8] sm:$0xff]  ;;  %v22_v28 = vld [vmem:[%s694_s2 + $0x18] sm:$0xff] }
   0x5   :  { %282 = vmatpush.msra.mxu3 %v553_v4  ;;  %v578_v9 = vld [vmem:[%s692_s1 + $0x20] sm:$0xff]  ;;  %v24_v30 = vld [vmem:[%s694_s2 + $0x28] sm:$0xff]  ;;  %v28_v39 = vld [vmem:[%s693_s3 + $0x18] sm:$0xff] }
   0x6   :  { %98 = vmatpush.msra.mxu0 %v558_v5  ;;  %v19_v10 = vld [vmem:[%s694_s2] sm:$0xff]  ;;  %v30_v40 = vld [vmem:[%s693_s3 + $0x28] sm:$0xff]  ;;  %v27_v56 = vld [vmem:[%s693_s3 + $0x10] sm:$0xff] }
   0x7   :  { %283 = vmatpush.msra.mxu3 %v563_v6  ;;  %v23_v29 = vld [vmem:[%s694_s2 + $0x20] sm:$0xff] }
   0x8   :  { %99 = vmatpush.msra.mxu0 %v573_v8  ;;  %v29_v62 = vld [vmem:[%s693_s3 + $0x20] sm:$0xff] }
   0x9   :  { %284 = vmatpush.msra.mxu3 %v578_v9  ;;  %451 = vmatmul.msk.f32.vlgmr.msra.gmra.mxu0 %vm65_vm0, %v19_v10 }
   0xa   :  { %469 = vmatmul.msk.f32.vlgmr.msra.gmra.mxu3 %vm65_vm0, %v19_v10 }
   0xc   :  { %42 = vperm.xlu0 %489, %v26_v11  }
  0x11   :  { %452 = vmatmul.msk.f32.gmra.mxu0 %vm65_vm0, %v20_v12 }
  0x12   :  { %470 = vmatmul.msk.f32.gmra.mxu3 %vm65_vm0, %v20_v12 }
  0x19   :  { %453 = vmatmul.msk.f32.gmra.mxu0 %vm65_vm0, %v21_v27 }
  0x1a   :  { %471 = vmatmul.msk.f32.gmra.mxu3 %vm65_vm0, %v21_v27 }
  0x21   :  { %454 = vmatmul.msk.f32.gmra.mxu0 %vm65_vm0, %v22_v28 }
  0x22   :  { %472 = vmatmul.msk.f32.gmra.mxu3 %vm65_vm0, %v22_v28 }
  0x29   :  { %455 = vmatmul.msk.f32.gmra.mxu0 %vm65_vm0, %v23_v29 }
  0x2a   :  { %473 = vmatmul.msk.f32.gmra.mxu3 %vm65_vm0, %v23_v29 }
  0x31   :  { %456 = vmatmul.msk.f32.gmra.mxu0 %vm65_vm0, %v24_v30 }
  0x32   :  { %474 = vmatmul.msk.f32.gmra.mxu3 %vm65_vm0, %v24_v30 }
  0x76   :  { %v38_v13 = vpop.permute.xlu0 %37 }
  0x7e   :  { %v43_v17 = vpop.permute.xlu0 %42 }
  0x86   :  { %v101_v14 = vpop.f32.mrf.mxu0 }
  0x87   :  { %v102_v15 = vadd.f32 %v101_v14, %v38_v13 }
  0x89   :  { %119 = vxpose.xlu1.b32.start.end [1/1] (short) (narrow) %v102_v15, 16 }
  0x8d   :  { %v286_v16 = vpop.f32.mrf.mxu3 }
  0x8e   :  { %v104_v18 = vpop.f32.mrf.mxu0  ;;  %v287_v22 = vadd.f32 %v286_v16, %v38_v13 }
  0x8f   :  { %v105_v19 = vadd.f32 %v104_v18, %v43_v17 }
  0x91   :  { %173 = vmatpush.msra.mxu2 %v105_v19 }
  0x95   :  { %v289_v20 = vpop.f32.mrf.mxu3 }
  0x96   :  { %v290_v21 = vadd.f32 %v289_v20, %v43_v17  ;;  %v107_v14 = vpop.f32.mrf.mxu0 }
  0x98   :  { %357 = vmatpush.msra.mxu1 %v290_v21 }
  0x99   :  { %304 = vxpose.xlu1.b32.start.end [1/1] (short) (narrow) %v287_v22, 16 }
  0x9d   :  { %v292_v22 = vpop.f32.mrf.mxu3 }
  0x9e   :  { %v110_v18 = vpop.f32.mrf.mxu0 }
  0xa6   :  { %v113_v21 = vpop.f32.mrf.mxu0 }
  0xae   :  { %v116_v29 = vpop.f32.mrf.mxu0 }
 0x12d   :  { %v135_v23 = vpop.trf.xlu1 }
 0x12e   :  { %457 = vmatmul.msk.f32.vlgmr.msra.gmra.mxu2 %vm151_vm1, %v135_v23 }
 0x135   :  { %v136_v24 = vpop.trf.xlu1 }
 0x136   :  { %458 = vmatmul.msk.f32.gmra.mxu2 %vm151_vm1, %v136_v24 }
 0x13d   :  { %v320_v25 = vpop.trf.xlu1 }
 0x13e   :  { %475 = vmatmul.msk.f32.vlgmr.msra.gmra.mxu1 %vm151_vm1, %v320_v25 }
 0x145   :  { %v321_v26 = vpop.trf.xlu1 }
 0x146   :  { %476 = vmatmul.msk.f32.gmra.mxu1 %vm151_vm1, %v321_v26 }
 0x1b1   :  { %v175_v31 = vpop.f32.mrf.mxu2 }
 0x1b2   :  { %v182_v32 = vsel %vm181_vm2, %v175_v31, -inf }
 0x1b3   :  { %183 = vmax.xlane.f32.xlu2 %v182_v32  ;;  %v295_v32 = vpop.f32.mrf.mxu3 }
 0x1b9   :  { %v178_v33 = vpop.f32.mrf.mxu2 }
 0x1ba   :  { %v185_v34 = vsel %vm181_vm2, %v178_v33, -inf }
 0x1bb   :  { %186 = vmax.xlane.f32.xlu2 %v185_v34  ;;  %v359_v35 = vpop.f32.mrf.mxu1 }
 0x1bc   :  { %v365_v36 = vsel %vm181_vm2, %v359_v35, -inf }
 0x1c3   :  { %366 = vmax.xlane.f32.xlu2 %v365_v36  ;;  %v362_v37 = vpop.f32.mrf.mxu1 }
 0x1c4   :  { %v368_v38 = vsel %vm181_vm2, %v362_v37, -inf }
 0x1c5   :  { %369 = vmax.xlane.f32.xlu0 %v368_v38 }
 0x1d9   :  { %52 = vperm.xlu0 %489, %v28_v39   ;;  %v251_v39 = vstv %s695_s0 }
 0x1e1   :  { %62 = vperm.xlu0 %489, %v30_v40  }
 0x226   :  { %v184_v41 = vpop.xlane.xlu2 %183 }
 0x227   :  { %v188_v42 = vsub.f32 %v175_v31, %v184_v41 }
 0x229   :  { %v190_v43 = vmul.f32 1.442695, %v188_v42 }
 0x22b   :  { %491 = vpow2.f32 %v190_v43 }
 0x22e   :  { %v187_v44 = vpop.xlane.xlu2 %186 }
 0x22f   :  { %v189_v45 = vsub.f32 %v178_v33, %v187_v44 }
 0x231   :  { %v492_v46 = vpop.eup %491  ;;  %v192_v47 = vmul.f32 1.442695, %v189_v45 }
 0x232   :  { %v194_v48 = vsel %vm181_vm2, %v492_v46, 0.0 }
 0x233   :  { %493 = vpow2.f32 %v192_v47  ;;  %195 = vadd.xlane.f32.xlu2 %v194_v48 }
 0x236   :  { %v367_v49 = vpop.xlane.xlu2 %366 }
 0x237   :  { %v371_v50 = vsub.f32 %v359_v35, %v367_v49  ;;  %v298_v35 = vpop.f32.mrf.mxu3 }
 0x238   :  { %v370_v57 = vpop.xlane.xlu0 %369 }
 0x239   :  { %v494_v51 = vpop.eup %493  ;;  %v373_v52 = vmul.f32 1.442695, %v371_v50  ;;  %v372_v58 = vsub.f32 %v362_v37, %v370_v57 }
 0x23a   :  { %v197_v53 = vsel %vm181_vm2, %v494_v51, 0.0 }
 0x23b   :  { %495 = vpow2.f32 %v373_v52  ;;  %198 = vadd.xlane.f32.xlu1 %v197_v53  ;;  %v375_v59 = vmul.f32 1.442695, %v372_v58 }
 0x23d   :  { %497 = vpow2.f32 %v375_v59 }
 0x23f   :  { %v301_v37 = vpop.f32.mrf.mxu3 }
 0x241   :  { %v496_v54 = vpop.eup %495 }
 0x242   :  { %v377_v55 = vsel %vm181_vm2, %v496_v54, 0.0 }
 0x243   :  { %378 = vadd.xlane.f32.xlu2 %v377_v55  ;;  %v498_v60 = vpop.eup %497 }
 0x244   :  { %v380_v61 = vsel %vm181_vm2, %v498_v60, 0.0 }
 0x24b   :  { %v53_v17 = vpop.permute.xlu0 %52 }
 0x24c   :  { %v111_v19 = vadd.f32 %v110_v18, %v53_v17  ;;  %v296_v34 = vadd.f32 %v295_v32, %v53_v17 }
 0x253   :  { %v63_v30 = vpop.permute.xlu0 %62 }
 0x254   :  { %v117_v33 = vadd.f32 %v116_v29, %v63_v30  ;;  %v302_v38 = vadd.f32 %v301_v37, %v63_v30 }
 0x25b   :  { %47 = vperm.xlu2 %490, %v27_v56  }
 0x284   :  { %381 = vadd.xlane.f32.xlu2 %v380_v61 }
 0x29c   :  { %57 = vperm.xlu2 %490, %v29_v62  }
 0x2a6   :  { %v196_v63 = vpop.xlane.xlu2 %195 }
 0x2ae   :  { %v199_v3 = vpop.xlane.xlu1 %198 }
 0x2af   :  { %499 = vrcp.f32 %v199_v3 }
 0x2b0   :  { %501 = vrcp.f32 %v196_v63 }
 0x2b5   :  { %v500_v7 = vpop.eup %499 }
 0x2b6   :  { %v379_v10 = vpop.xlane.xlu2 %378  ;;  %v203_v11 = vmul.f32 %v500_v7, %v494_v51  ;;  %v502_v12 = vpop.eup %501 }
 0x2b7   :  { %v202_v13 = vmul.f32 %v502_v12, %v492_v46 }
 0x2b8   :  { %459 = vmatpush.xpose.msk.msrb.mxu2 %vm181_vm2, %v203_v11 }
 0x2bc   :  { %460 = vmatpush.xpose.msk.msrb.mxu2 %vm181_vm2, %v202_v13 }
 0x2be   :  { %v48_v15 = vpop.permute.xlu2 %47 }
 0x2bf   :  { %v108_v16 = vadd.f32 %v107_v14, %v48_v15  ;;  %v293_v31 = vadd.f32 %v292_v22, %v48_v15 }
 0x2c1   :  { %461 = vmatmul.msk.f32.vlgmr.msrb.gmra.mxu2 %vm181_vm2, %v108_v16 }
 0x2c9   :  { %462 = vmatmul.msk.f32.gmra.mxu2 %vm181_vm2, %v111_v19 }
 0x2f7   :  { %v382_v20 = vpop.xlane.xlu2 %381 }
 0x2f8   :  { %503 = vrcp.f32 %v382_v20 }
 0x2f9   :  { %505 = vrcp.f32 %v379_v10 }
 0x2fe   :  { %v504_v23 = vpop.eup %503 }
 0x2ff   :  { %v58_v24 = vpop.permute.xlu2 %57  ;;  %v386_v25 = vmul.f32 %v504_v23, %v498_v60  ;;  %v506_v26 = vpop.eup %505 }
 0x300   :  { %v114_v27 = vadd.f32 %v113_v21, %v58_v24  ;;  %v385_v28 = vmul.f32 %v506_v26, %v496_v54  ;;  %v299_v36 = vadd.f32 %v298_v35, %v58_v24 }
 0x301   :  { %477 = vmatpush.xpose.msk.msrb.mxu1 %vm181_vm2, %v386_v25 }
 0x302   :  { %463 = vmatmul.msk.f32.gmra.mxu2 %vm181_vm2, %v114_v27 }
 0x305   :  { %478 = vmatpush.xpose.msk.msrb.mxu1 %vm181_vm2, %v385_v28 }
 0x308   :  { %479 = vmatmul.msk.f32.vlgmr.msrb.gmra.mxu1 %vm181_vm2, %v293_v31 }
 0x30a   :  { %464 = vmatmul.msk.f32.gmra.mxu2 %vm181_vm2, %v117_v33 }
 0x310   :  { %480 = vmatmul.msk.f32.gmra.mxu1 %vm181_vm2, %v296_v34 }
 0x318   :  { %481 = vmatmul.msk.f32.gmra.mxu1 %vm181_vm2, %v299_v36 }
 0x320   :  { %482 = vmatmul.msk.f32.gmra.mxu1 %vm181_vm2, %v302_v38 }
 0x344   :  { %v239_v40 = vpop.f32.mrf.mxu2 }
 0x345   :  { %v252_v41 = vmul.f32 %v251_v39, %v239_v40 }
 0x347   :  { %v256_v42 = vadd.f32 %v252_v41, %v573_v8 }
 0x349   :  { %260 = vst.msk [vmem:[%s696_s4] sm:$0xff] %vm181_vm2, %v256_v42 }
 0x34c   :  { %v242_v43 = vpop.f32.mrf.mxu2 }
 0x34d   :  { %v253_v44 = vmul.f32 %v251_v39, %v242_v43 }
 0x34f   :  { %v257_v45 = vadd.f32 %v253_v44, %v558_v5 }
 0x351   :  { %261 = vst.msk [vmem:[%s696_s4 + $0x8] sm:$0xff] %vm181_vm2, %v257_v45 }
 0x385   :  { %v245_v46 = vpop.f32.mrf.mxu2  ;;  %v422_v47 = vpop.f32.mrf.mxu1 }
 0x386   :  { %v254_v48 = vmul.f32 %v251_v39, %v245_v46  ;;  %v434_v49 = vmul.f32 %v422_v47, %v251_v39 }
 0x388   :  { %v258_v8 = vadd.f32 %v254_v48, %v546_v2  ;;  %v438_v50 = vadd.f32 %v578_v9, %v434_v49 }
 0x38a   :  { %262 = vst.msk [vmem:[%s696_s4 + $0x10] sm:$0xff] %vm181_vm2, %v258_v8 }
 0x38b   :  { %483 = vst.msk [vmem:[%s696_s4 + $0x20] sm:$0xff] %vm181_vm2, %v438_v50 }
 0x38d   :  { %v248_v5 = vpop.f32.mrf.mxu2  ;;  %v425_v51 = vpop.f32.mrf.mxu1 }
 0x38e   :  { %v255_v52 = vmul.f32 %v251_v39, %v248_v5  ;;  %v435_v53 = vmul.f32 %v425_v51, %v251_v39 }
 0x390   :  { %v259_v54 = vadd.f32 %v255_v52, %v536_v0  ;;  %v439_v2 = vadd.f32 %v563_v6, %v435_v53 }
 0x392   :  { %263 = vst.msk [vmem:[%s696_s4 + $0x18] sm:$0xff] %vm181_vm2, %v259_v54 }
 0x393   :  { %484 = vst.msk [vmem:[%s696_s4 + $0x28] sm:$0xff] %vm181_vm2, %v439_v2 }
 0x395   :  { %v428_v9 = vpop.f32.mrf.mxu1 }
 0x396   :  { %v436_v55 = vmul.f32 %v428_v9, %v251_v39 }
 0x398   :  { %v440_v56 = vadd.f32 %v553_v4, %v436_v55 }
 0x39a   :  { %485 = vst.msk [vmem:[%s696_s4 + $0x30] sm:$0xff] %vm181_vm2, %v440_v56 }
 0x39d   :  { %v431_v0 = vpop.f32.mrf.mxu1 }
 0x39e   :  { %v437_v6 = vmul.f32 %v431_v0, %v251_v39 }
 0x3a0   :  { %v441_v57 = vadd.f32 %v541_v1, %v437_v6 }
 0x3a2   :  { %486 = vst.msk [vmem:[%s696_s4 + $0x38] sm:$0xff] %vm181_vm2, %v441_v57 }

</bundles_post_ra>
